<compile_context>
chip_gen: v6e
topology: v6e:2x2x1
jax: 0.10.0
libtpu: 0.0.40
codegen_flags: <defaults>
</compile_context>

<pallas_src>
import functools

import jax
import jax.numpy as jnp
from jax.experimental import pallas as pl
from jax.experimental.pallas import tpu as pltpu


def _gate_kernel(x_cat_ref, x_struct_ref, w_ref, b_ref, o_ref):
    # Single fused matmul on the MXU: [h_pre | z_pre] = x @ [W_h | W_z] + [b_h | b_z]
    hz = jnp.dot(x_cat_ref[...], w_ref[...], preferred_element_type=jnp.float32)
    hz = hz + b_ref[...].astype(jnp.float32)          # one (1, 2D) -> (blk, 2D) broadcast

    d = o_ref.shape[-1]
    h = jnp.tanh(hz[:, :d])                           # EUP
    z = jax.nn.sigmoid(hz[:, d:])                     # EUP

    x_s = x_struct_ref[...].astype(jnp.float32)       # no-op for f32, upcast for bf16 storage
    # z*h + (1-z)*x_s  ==  x_s + z*(h - x_s)   (one fewer VPU mul + sub)
    o_ref[...] = (x_s + z * (h - x_s)).astype(o_ref.dtype)


@functools.partial(jax.jit, static_argnames=("block_b",))
def literal_e_gate(x_cat, x_struct, w_hz, b_hz, *, block_b=1024):
    """Fused LiteralE gate.

    x_cat:    (B, input_dim)
    x_struct: (B, output_dim)
    w_hz:     (input_dim, 2*output_dim)   == concat([W_h^T, W_z^T], axis=1)
    b_hz:     (1, 2*output_dim)           == concat([b_h, b_z], axis=1)
    """
    B, input_dim = x_cat.shape
    output_dim = x_struct.shape[1]
    two_out = w_hz.shape[1]

    # Round the row tile to a multiple of 8 (sublane constraint) and clamp it
    # to the (rounded-up) batch so tiny batches don't allocate a huge block.
    b_round = -(-B // 8) * 8
    blk = min(max(block_b, 8), b_round)
    blk = -(-blk // 8) * 8
    grid = (pl.cdiv(B, blk),)

    return pl.pallas_call(
        _gate_kernel,
        out_shape=jax.ShapeDtypeStruct((B, output_dim), x_struct.dtype),
        grid_spec=pl.GridSpec(
            grid=grid,
            in_specs=[
                pl.BlockSpec((blk, input_dim), lambda i: (i, 0)),    # x_cat tile
                pl.BlockSpec((blk, output_dim), lambda i: (i, 0)),   # x_struct tile
                pl.BlockSpec((input_dim, two_out), lambda i: (0, 0)),  # fused W (resident)
                pl.BlockSpec((1, two_out), lambda i: (0, 0)),          # fused bias (resident)
            ],
            out_specs=pl.BlockSpec((blk, output_dim), lambda i: (i, 0)),
        ),
        compiler_params=pltpu.CompilerParams(
            dimension_semantics=("parallel",),
        ),
    )(x_cat, x_struct, w_hz, b_hz)


def literal_e_gate_ref(x_cat, x_struct, w_z, b_z, w_h, b_h):
    """Pure-JAX reference matching the PyTorch module (weights pre-transposed)."""
    h = jnp.tanh(x_cat @ w_h + b_h)
    z = jax.nn.sigmoid(x_cat @ w_z + b_z)
    return z * h + (1.0 - z) * x_struct


if __name__ == "__main__":
    key = jax.random.PRNGKey(0)
    struct_dim = 32   # structural embedding dim == output_dim
    lit_dim = 16      # literal feature dim
    input_dim = struct_dim + lit_dim
    output_dim = struct_dim

    k1, k2, k3, k4, k5, k6 = jax.random.split(key, 6)

    # Deterministic parameter init (matches nn.Linear uniform(-1/sqrt(fan_in), ...)).
    bound = 1.0 / jnp.sqrt(input_dim)
    w_z = jax.random.uniform(k1, (input_dim, output_dim), jnp.float32, -bound, bound)
    b_z = jax.random.uniform(k2, (1, output_dim), jnp.float32, -bound, bound)
    w_h = jax.random.uniform(k3, (input_dim, output_dim), jnp.float32, -bound, bound)
    b_h = jax.random.uniform(k4, (1, output_dim), jnp.float32, -bound, bound)

    # Fused parameters for the kernel: kernel slices [:d] -> h path, [d:] -> z path.
    w_hz = jnp.concatenate([w_h, w_z], axis=1)   # (input_dim, 2*output_dim)
    b_hz = jnp.concatenate([b_h, b_z], axis=1)   # (1, 2*output_dim)

    def make_inputs(kk, B):
        ka, kb = jax.random.split(kk)
        x_struct = jax.random.normal(ka, (B, struct_dim), jnp.float32)
        x_lit = jax.random.normal(kb, (B, lit_dim), jnp.float32)
        x_cat = jnp.concatenate([x_struct, x_lit], axis=-1)
        return x_cat, x_struct

    # Case 1: small batch, explicit small tile (multi-step grid, exact tiling).
    x_cat, x_struct = make_inputs(k5, 64)
    out = jax.block_until_ready(literal_e_gate(x_cat, x_struct, w_hz, b_hz, block_b=16))
    ref = literal_e_gate_ref(x_cat, x_struct, w_z, b_z, w_h, b_h)
    assert out.shape == (64, output_dim)
    assert jnp.allclose(out, ref, atol=1e-5, rtol=1e-5), "mismatch vs reference (case 1)"

    # Case 2: default (large) tile — wrapper clamps the block to the batch.
    x_cat2, x_struct2 = make_inputs(k6, 40)
    out2 = jax.block_until_ready(literal_e_gate(x_cat2, x_struct2, w_hz, b_hz))
    ref2 = literal_e_gate_ref(x_cat2, x_struct2, w_z, b_z, w_h, b_h)
    assert out2.shape == (40, output_dim)
    assert jnp.allclose(out2, ref2, atol=1e-5, rtol=1e-5), "mismatch vs reference (case 2)"

    print("KERNEL_OK")
</pallas_src>

<mosaic_0001>
module attributes {stable_mosaic.version = 11 : i64} {
  func.func @_gate_kernel(%arg0: i32, %arg1: memref<16x48xf32, #tpu.memory_space<vmem>>, %arg2: memref<16x32xf32, #tpu.memory_space<vmem>>, %arg3: memref<48x64xf32, #tpu.memory_space<vmem>>, %arg4: memref<1x64xf32, #tpu.memory_space<vmem>>, %arg5: memref<16x32xf32, #tpu.memory_space<vmem>>) attributes {dimension_semantics = [#tpu.dimension_semantics<parallel>], iteration_bounds = array<i64: 4>, scalar_prefetch = 0 : i64, scratch_operands = 0 : i64, tpu.core_type = #tpu.core_type<tc>, window_params = [{transform_indices = @transform_0, window_bounds = array<i64: 16, 48>}, {transform_indices = @transform_1, window_bounds = array<i64: 16, 32>}, {pipeline_mode = #tpu.pipeline_mode<synchronous>, transform_indices = @transform_2, window_bounds = array<i64: 48, 64>}, {pipeline_mode = #tpu.pipeline_mode<synchronous>, transform_indices = @transform_3, window_bounds = array<i64: 1, 64>}, {transform_indices = @transform_4, window_bounds = array<i64: 16, 32>}]} {
    %c0 = arith.constant 0 : index
    %c0_0 = arith.constant 0 : index
    %0 = vector.load %arg1[%c0, %c0_0] : memref<16x48xf32, #tpu.memory_space<vmem>>, vector<16x48xf32>
    %c0_1 = arith.constant 0 : index
    %c0_2 = arith.constant 0 : index
    %1 = vector.load %arg3[%c0_1, %c0_2] : memref<48x64xf32, #tpu.memory_space<vmem>>, vector<48x64xf32>
    %cst = arith.constant dense<0.000000e+00> : vector<16x64xf32>
    %2 = tpu.matmul %0, %1, %cst {dimension_numbers = #tpu.dot_dimension_numbers<[1], [0], [0], [1], [0, 0, 1, 1], [], []>} : vector<16x48xf32>, vector<48x64xf32>, vector<16x64xf32> -> vector<16x64xf32>
    %c0_3 = arith.constant 0 : index
    %c0_4 = arith.constant 0 : index
    %3 = vector.load %arg4[%c0_3, %c0_4] : memref<1x64xf32, #tpu.memory_space<vmem>>, vector<1x64xf32>
    %4 = vector.broadcast %3 : vector<1x64xf32> to vector<16x64xf32>
    %5 = arith.addf %2, %4 : vector<16x64xf32>
    %6 = vector.extract_strided_slice %5 {offsets = [0, 0], sizes = [16, 32], strides = [1, 1]} : vector<16x64xf32> to vector<16x32xf32>
    %7 = math.tanh %6 : vector<16x32xf32>
    %8 = vector.extract_strided_slice %5 {offsets = [0, 32], sizes = [16, 32], strides = [1, 1]} : vector<16x64xf32> to vector<16x32xf32>
    %9 = arith.negf %8 : vector<16x32xf32>
    %10 = math.exp %9 : vector<16x32xf32>
    %cst_5 = arith.constant 1.000000e+00 : f32
    %11 = vector.broadcast %cst_5 : f32 to vector<16x32xf32>
    %12 = arith.addf %11, %10 : vector<16x32xf32>
    %13 = arith.divf %11, %12 : vector<16x32xf32>
    %c0_6 = arith.constant 0 : index
    %c0_7 = arith.constant 0 : index
    %14 = vector.load %arg2[%c0_6, %c0_7] : memref<16x32xf32, #tpu.memory_space<vmem>>, vector<16x32xf32>
    %15 = arith.subf %7, %14 : vector<16x32xf32>
    %16 = arith.mulf %13, %15 : vector<16x32xf32>
    %17 = arith.addf %14, %16 : vector<16x32xf32>
    %c0_8 = arith.constant 0 : index
    %c0_9 = arith.constant 0 : index
    %18 = vector.load %arg5[%c0_8, %c0_9] : memref<16x32xf32, #tpu.memory_space<vmem>>, vector<16x32xf32>
    tpu.vector_store %arg5[%c0_8, %c0_9], %17 {strides = array<i32>} : memref<16x32xf32, #tpu.memory_space<vmem>>, vector<16x32xf32>,
    return
  }
  func.func @transform_0(%arg0: i32) -> (i32, i32) {
    %c0_i32 = arith.constant 0 : i32
    %c0_i32_0 = arith.constant 0 : i32
    return %arg0, %c0_i32 : i32, i32
  }
  func.func @transform_1(%arg0: i32) -> (i32, i32) {
    %c0_i32 = arith.constant 0 : i32
    %c0_i32_0 = arith.constant 0 : i32
    return %arg0, %c0_i32 : i32, i32
  }
  func.func @transform_2(%arg0: i32) -> (i32, i32) {
    %c0_i32 = arith.constant 0 : i32
    %c0_i32_0 = arith.constant 0 : i32
    %c0_i32_1 = arith.constant 0 : i32
    return %c0_i32, %c0_i32_0 : i32, i32
  }
  func.func @transform_3(%arg0: i32) -> (i32, i32) {
    %c0_i32 = arith.constant 0 : i32
    %c0_i32_0 = arith.constant 0 : i32
    %c0_i32_1 = arith.constant 0 : i32
    return %c0_i32, %c0_i32_0 : i32, i32
  }
  func.func @transform_4(%arg0: i32) -> (i32, i32) {
    %c0_i32 = arith.constant 0 : i32
    %c0_i32_0 = arith.constant 0 : i32
    return %arg0, %c0_i32 : i32, i32
  }
}

</mosaic_0001>

<bundles_post_ra>
// kernel: literal_e_gate.1
= control target key start
LH: loop header
LB: loop body
LE: loop exit
PB: predicated region body
PF: predicated region fallthrough
CT: control target
= control target key end

     0   :  { %s527_s15 = smov 0   ;;  %s573_s0 = inlined_call_operand.vmem [shape: f32[64,48], index: 0, kind: input, shape index: {}]   ;;  %s574_s1 = inlined_call_operand.vmem [shape: f32[64,32], index: 1, kind: input, shape index: {}]   ;;  %s575_s2 = inlined_call_operand.vmem [shape: f32[48,64], index: 2, kind: input, shape index: {}]   ;;  %s576_s3 = inlined_call_operand.vmem [shape: f32[1,64], index: 3, kind: input, shape index: {}]   ;;  %s577_s4 = inlined_call_operand.vmem [shape: f32[64,32], index: 4, kind: output, shape index: {}]  }
   0x1 LB: > { %s429_s16 = sadd.s32 4294967295, %s498_s15   ;;  %p433_p0 = scmp.ge.s32.totalorder %s498_s15, 1  ;;  %s498_s15 = sphi %s527_s15, %s14_s15  }
   0x2   : > { %p174_p1 = scmp.lt.s32.totalorder %s498_s15, 5 }
   0x4   : > { %p175_p2 = pnand %p433_p0, %p174_p1 }
   0x5   : > { %s434_s21 = sshll.u32 (!%p175_p2), %s429_s16, 1  ;;  %s500_s13 = smov (!%p175_p2), 32  }
   0x6   : > { %178 = sbr.rel (%p175_p2) target bundleno = 476 (0x1dc), region = 36  ;;  %p206_p3 = scmp.lt.s32.totalorder (!%p175_p2), %s434_s21, 7 }
   0x7   : > { %s501_s14 = smov (!%p175_p2), 96  }
   0xb   : > { %v230_v0 = vld [vmem:[%s575_s2 + $0x28] sm:$0xff]  ;;  %v229_v1 = vld [vmem:[%s575_s2 + $0x20] sm:$0xff]  ;;  %v228_v2 = vld [vmem:[%s575_s2 + $0x18] sm:$0xff]  ;;  %s579_s21 = smov (!%p206_p3, %s434_s21), 7  ;;  %vm238_vm0 = vcmask 392192   ;;  %vm358_vm1 = vcmask 261120  }
   0xc   : > { %455 = vmatprep.subr.mxu0 %v230_v0  ;;  %v227_v3 = vld [vmem:[%s575_s2 + $0x10] sm:$0xff]  ;;  %s547_s26 = sshll.u32 %s579_s21, 3  ;;  %v226_v4 = vld [vmem:[%s575_s2 + $0x8] sm:$0xff]  ;;  %v225_v6 = vld [vmem:[%s575_s2] sm:$0xff] }
   0xd   : > { %456 = vmatpush3.msra.mxu0 %v230_v0  ;;  %s209_s5 = scalar_lea.vmem %s573_s0, %s547_s26  ;;  %v440_v9 = vld [vmem:[%s576_s3] ss:$0 sm:$0xff]  ;;  %s215_s12 = scalar_lea.vmem %s574_s1, %s547_s26 }
   0xe   : > { %457 = vmatprep.subr.mxu0 %v229_v1  ;;  %v223_v5 = vld [vmem:[%s209_s5] sm:$0xff]  ;;  %v224_v7 = vld [vmem:[%s209_s5 + $0x8] sm:$0xff]  ;;  %s221_s18 = scalar_lea.vmem %s577_s4, %s547_s26 }
   0xf   : > { %458 = vmatpush3.msra.mxu0 %v229_v1  ;;  %467 = vmatprep.mubr.msk.f32.mxu0 %vm238_vm0, %v223_v5  ;;  %v334_v13 = vld [vmem:[%s215_s12] sm:$0xff]  ;;  %v335_v17 = vld [vmem:[%s215_s12 + $0x8] sm:$0xff] }
  0x10   : > { %459 = vmatprep.subr.mxu0 %v228_v2 }
  0x11   : > { %460 = vmatpush3.msra.mxu0 %v228_v2 }
  0x12   : > { %461 = vmatprep.subr.mxu0 %v227_v3 }
  0x13   : > { %462 = vmatpush3.msra.mxu0 %v227_v3 }
  0x14   : > { %463 = vmatprep.subr.mxu0 %v226_v4 }
  0x15   : > { %464 = vmatpush3.msra.mxu0 %v226_v4 }
  0x16   : > { %465 = vmatprep.subr.mxu0 %v225_v6 }
  0x17   : > { %466 = vmatpush3.msra.mxu0 %v225_v6 }
  0x18   : > { %468 = vmatmul.mubr.msk.f32.vlgmr.msra.gmra.mxu0 %vm238_vm0, %v224_v7 }
  0xd8   : > { %v469_v8 = vpop.f32.mrf.mxu0 }
  0xd9   : > { %v317_v12 = vadd.f32 %v469_v8, %v440_v9 }
  0xda   : > { %v311_v10 = vpop.f32.mrf.mxu0 }
  0xdb   : > { %v312_v11 = vadd.f32 %v440_v9, %v311_v10  ;;  %v444_v20 = vmul.f32 -1.442695, %v317_v12 }
  0xdd   : > { %480 = vtanh.f32 %v312_v11  ;;  %v443_v19 = vmul.f32 -1.442695, %v312_v11 }
  0xde   : > { %482 = vtanh.f32 %v317_v12 }
  0xdf   : > { %484 = vpow2.f32 %v443_v19 }
  0xe0   : > { %486 = vpow2.f32 %v444_v20 }
  0xea   : > { %v481_v14 = vpop.eup %480 }
  0xeb   : > { %v336_v15 = vsub.f32 %v481_v14, %v334_v13  ;;  %v483_v16 = vpop.eup %482 }
  0xec   : > { %v337_v18 = vsub.f32 %v483_v16, %v335_v17  ;;  %v485_v21 = vpop.eup %484 }
  0xed   : > { %340 = vrot.lane.b32.xlu0 %v336_v15, %s500_s13  ;;  %v328_v22 = vadd.f32 1.0, %v485_v21  ;;  %v487_v23 = vpop.eup %486 }
  0xee   : > { %v329_v24 = vadd.f32 1.0, %v487_v23 }
  0xef   : > { %488 = vrcp.f32 %v328_v22 }
  0xf0   : > { %490 = vrcp.f32 %v329_v24 }
  0xf1   : > { %342 = vrot.lane.b32.xlu0 %v337_v18, %s500_s13 }
  0xfc   : > { %v489_v25 = vpop.eup %488 }
  0xfd   : > { %v491_v28 = vpop.eup %490 }
 0x15f   : > { %v341_v26 = vpop.permute.xlu0 %340 }
 0x160   : > { %v346_v27 = vmul.f32 %v489_v25, %v341_v26 }
 0x162   : > { %350 = vrot.lane.b32.xlu1 %v346_v27, %s501_s14 }
 0x163   : > { %v343_v29 = vpop.permute.xlu0 %342 }
 0x164   : > { %v347_v30 = vmul.f32 %v491_v28, %v343_v29 }
 0x166   : > { %352 = vrot.lane.b32.xlu1 %v347_v30, %s501_s14 }
 0x1d4   : > { %v351_v31 = vpop.permute.xlu1 %350 }
 0x1d5   : > { %v356_v32 = vadd.f32 %v351_v31, %v334_v13 }
 0x1d7   : > { %359 = vst.msk [vmem:[%s221_s18] sm:$0xff] %vm358_vm1, %v356_v32 }
 0x1d8   : > { %v353_v33 = vpop.permute.xlu1 %352 }
 0x1d9   : > { %v357_v34 = vadd.f32 %v353_v33, %v335_v17 }
 0x1db   : > { %360 = vst.msk [vmem:[%s221_s18 + $0x8] sm:$0xff] %vm358_vm1, %v357_v34 }
 0x1dc PF: > { %s14_s15 = sadd.s32 1, %s498_s15  }
 0x1dd   : > { %p11_p4 = scmp.ge.s32.totalorder %s14_s15, 6  }
 0x1df   :  { %13 = sbr.rel (!%p11_p4) target bundleno = 1 (0x1), region = 69 }

</bundles_post_ra>
